<compile_context>
chip_gen: v7x
topology: tpu7x:2x2x1
jax: 0.10.0
libtpu: 0.0.40
codegen_flags: <defaults>
</compile_context>

<pallas_src>
import jax
import jax.numpy as jnp
import numpy as np
from jax.experimental import pallas as pl
from jax.experimental.pallas import tpu as pltpu

# ---------------- model dims (small, TPU-lane friendly: E, H, V multiples of 128) ----
B = 8          # batch
E = 128        # embedding_size
H = 128        # hidden_size
V = 256        # input_size (vocab)
NUM_LAYERS = 2


def _decoder_kernel(xt_ref, emb_ref, h_ref, c_ref,
                    w0_ref, b0_ref, w1_ref, b1_ref,
                    wlin_ref, blin_ref,
                    logits_ref, h_out_ref, c_out_ref):
    """Single decode step: embedding gather + 2 stacked LSTM cells + output projection."""
    Bb = h_ref.shape[1]
    Hh = h_ref.shape[2]
    Vv = emb_ref.shape[0]

    def sigmoid(x):
        # 1 EUP push + 1 FMA instead of exp + reciprocal.
        return 0.5 * jnp.tanh(0.5 * x) + 0.5

    def lstm_cell(xcat_bf16, c_prev, w_ref, b_ref):
        # Fused [x|h] @ [W_ih; W_hh] : one MXU pass, f32 accumulation.
        gates = jnp.dot(xcat_bf16, w_ref[...],
                        preferred_element_type=jnp.float32) + b_ref[...]
        i = sigmoid(gates[:, 0 * Hh:1 * Hh])
        f = sigmoid(gates[:, 1 * Hh:2 * Hh])
        g = jnp.tanh(gates[:, 2 * Hh:3 * Hh])
        o = sigmoid(gates[:, 3 * Hh:4 * Hh])
        c_new = f * c_prev + i * g
        h_new = o * jnp.tanh(c_new)
        return h_new, c_new

    # ---- embedding lookup as a one-hot matmul on the MXU (exact gather) ----
    tok = xt_ref[...]                                                   # (B, 1) int32
    onehot = (jax.lax.broadcasted_iota(jnp.int32, (Bb, Vv), 1)
              == tok).astype(emb_ref.dtype)                             # (B, V) bf16
    embed = jnp.dot(onehot, emb_ref[...],
                    preferred_element_type=jnp.float32)                 # (B, E) f32

    # Old state (read everything before the aliased writes below).
    h0, c0 = h_ref[0], c_ref[0]
    h1, c1 = h_ref[1], c_ref[1]

    # ---- layer 0 ----
    x0 = jnp.concatenate([embed, h0], axis=1).astype(jnp.bfloat16)      # (B, E+H)
    h0n, c0n = lstm_cell(x0, c0, w0_ref, b0_ref)

    # ---- layer 1 ----
    x1 = jnp.concatenate([h0n, h1], axis=1).astype(jnp.bfloat16)        # (B, 2H)
    h1n, c1n = lstm_cell(x1, c1, w1_ref, b1_ref)

    # ---- output projection ----
    logits_ref[...] = jnp.dot(h1n.astype(jnp.bfloat16), wlin_ref[...],
                              preferred_element_type=jnp.float32) + blin_ref[...]

    # ---- state writeback (aliased in place with the h/c inputs) ----
    h_out_ref[0] = h0n
    h_out_ref[1] = h1n
    c_out_ref[0] = c0n
    c_out_ref[1] = c1n


def decoder_step(xt, state, params):
    """Mirrors Decoder.forward(xt, state) -> (logits, (h, c))."""
    h, c = state                                    # each (NUM_LAYERS, B, H) f32
    xt_2d = xt.reshape(B, 1).astype(jnp.int32)      # token ids, VMEM-friendly shape

    vmem = lambda: pl.BlockSpec(memory_space=pltpu.MemorySpace.VMEM)

    out_shapes = (
        jax.ShapeDtypeStruct((B, V), jnp.float32),              # logits
        jax.ShapeDtypeStruct((NUM_LAYERS, B, H), jnp.float32),  # new h
        jax.ShapeDtypeStruct((NUM_LAYERS, B, H), jnp.float32),  # new c
    )

    logits, h_new, c_new = pl.pallas_call(
        _decoder_kernel,
        out_shape=out_shapes,
        in_specs=[vmem() for _ in range(10)],
        out_specs=tuple(vmem() for _ in range(3)),
        # Alias state in/out: input 2 (h) -> output 1, input 3 (c) -> output 2.
        input_output_aliases={2: 1, 3: 2},
    )(xt_2d, params["emb"], h, c,
      params["w0"], params["b0"],
      params["w1"], params["b1"],
      params["wlin"], params["blin"])

    return logits, (h_new, c_new)


def _reference_step(xt, state, params):
    """Pure-JAX reference mirroring the kernel's precision policy (bf16 matmul inputs,
    f32 accumulation, f32 gate math)."""
    h, c = state
    x = jnp.take(params["emb"].astype(jnp.float32), xt, axis=0)     # (B, E)

    def cell(xcat, cc, w, b):
        g = jnp.dot(xcat.astype(jnp.bfloat16), w,
                    preferred_element_type=jnp.float32) + b
        i = jax.nn.sigmoid(g[:, 0 * H:1 * H])
        f = jax.nn.sigmoid(g[:, 1 * H:2 * H])
        gg = jnp.tanh(g[:, 2 * H:3 * H])
        o = jax.nn.sigmoid(g[:, 3 * H:4 * H])
        cn = f * cc + i * gg
        return o * jnp.tanh(cn), cn

    h0n, c0n = cell(jnp.concatenate([x, h[0]], axis=1), c[0],
                    params["w0"], params["b0"])
    h1n, c1n = cell(jnp.concatenate([h0n, h[1]], axis=1), c[1],
                    params["w1"], params["b1"])
    logits = jnp.dot(h1n.astype(jnp.bfloat16), params["wlin"],
                     preferred_element_type=jnp.float32) + params["blin"]
    return logits, (jnp.stack([h0n, h1n]), jnp.stack([c0n, c1n]))


def init_params(key):
    ks = jax.random.split(key, 8)
    s = 0.1
    f32 = jnp.float32

    wih0 = jax.random.normal(ks[1], (E, 4 * H), f32) * s
    whh0 = jax.random.normal(ks[2], (H, 4 * H), f32) * s
    wih1 = jax.random.normal(ks[4], (H, 4 * H), f32) * s
    whh1 = jax.random.normal(ks[5], (H, 4 * H), f32) * s

    return {
        # embedding table, bf16 storage
        "emb":  (jax.random.normal(ks[0], (V, E), f32) * s).astype(jnp.bfloat16),
        # layer 0: fused [W_ih; W_hh] of shape (E + H, 4H), bf16
        "w0":   jnp.concatenate([wih0, whh0], axis=0).astype(jnp.bfloat16),
        "b0":   jax.random.normal(ks[3], (1, 4 * H), f32) * s,      # b_ih + b_hh fused
        # layer 1: fused [W_ih; W_hh] of shape (2H, 4H), bf16
        "w1":   jnp.concatenate([wih1, whh1], axis=0).astype(jnp.bfloat16),
        "b1":   jax.random.normal(ks[6], (1, 4 * H), f32) * s,
        # output projection hidden -> vocab
        "wlin": (jax.random.normal(ks[7], (H, V), f32) * s).astype(jnp.bfloat16),
        "blin": jnp.zeros((1, V), f32),
    }


if __name__ == "__main__":
    key = jax.random.PRNGKey(0)
    kp, kx, kh, kc = jax.random.split(key, 4)

    params = init_params(kp)
    xt = jax.random.randint(kx, (B,), 0, V, dtype=jnp.int32)
    h0 = jax.random.normal(kh, (NUM_LAYERS, B, H), jnp.float32)
    c0 = jax.random.normal(kc, (NUM_LAYERS, B, H), jnp.float32)

    logits, (h1, c1) = jax.jit(decoder_step)(xt, (h0, c0), params)
    jax.block_until_ready((logits, h1, c1))

    ref_logits, (ref_h, ref_c) = _reference_step(xt, (h0, c0), params)
    np.testing.assert_allclose(np.asarray(logits), np.asarray(ref_logits), atol=1e-2, rtol=1e-2)
    np.testing.assert_allclose(np.asarray(h1), np.asarray(ref_h), atol=1e-2, rtol=1e-2)
    np.testing.assert_allclose(np.asarray(c1), np.asarray(ref_c), atol=1e-2, rtol=1e-2)

    print("KERNEL_OK")
</pallas_src>

<mosaic_0001>
module attributes {stable_mosaic.version = 11 : i64} {
  func.func @_decoder_kernel(%arg0: memref<8x1xi32, #tpu.memory_space<vmem>>, %arg1: memref<256x128xbf16, #tpu.memory_space<vmem>>, %arg2: memref<2x8x128xf32, #tpu.memory_space<vmem>>, %arg3: memref<2x8x128xf32, #tpu.memory_space<vmem>>, %arg4: memref<256x512xbf16, #tpu.memory_space<vmem>>, %arg5: memref<1x512xf32, #tpu.memory_space<vmem>>, %arg6: memref<256x512xbf16, #tpu.memory_space<vmem>>, %arg7: memref<1x512xf32, #tpu.memory_space<vmem>>, %arg8: memref<128x256xbf16, #tpu.memory_space<vmem>>, %arg9: memref<1x256xf32, #tpu.memory_space<vmem>>, %arg10: memref<8x256xf32, #tpu.memory_space<vmem>>, %arg11: memref<2x8x128xf32, #tpu.memory_space<vmem>>, %arg12: memref<2x8x128xf32, #tpu.memory_space<vmem>>) attributes {dimension_semantics = [], scalar_prefetch = 0 : i64, scratch_operands = 0 : i64, tpu.core_type = #tpu.core_type<tc>} {
    %c0 = arith.constant 0 : index
    %c0_0 = arith.constant 0 : index
    %0 = vector.load %arg0[%c0, %c0_0] : memref<8x1xi32, #tpu.memory_space<vmem>>, vector<8x1xi32>
    %1 = tpu.iota {dimensions = array<i32: 1>} : vector<8x256xi32>
    %2 = vector.broadcast %0 : vector<8x1xi32> to vector<8x256xi32>
    %3 = arith.cmpi eq, %1, %2 : vector<8x256xi32>
    %4 = arith.extui %3 : vector<8x256xi1> to vector<8x256xi32>
    %5 = arith.sitofp %4 : vector<8x256xi32> to vector<8x256xf32>
    %6 = arith.truncf %5 : vector<8x256xf32> to vector<8x256xbf16>
    %c0_1 = arith.constant 0 : index
    %c0_2 = arith.constant 0 : index
    %7 = vector.load %arg1[%c0_1, %c0_2] : memref<256x128xbf16, #tpu.memory_space<vmem>>, vector<256x128xbf16>
    %cst = arith.constant dense<0.000000e+00> : vector<8x128xf32>
    %8 = tpu.matmul %6, %7, %cst {dimension_numbers = #tpu.dot_dimension_numbers<[1], [0], [0], [1], [0, 0, 1, 1], [], []>} : vector<8x256xbf16>, vector<256x128xbf16>, vector<8x128xf32> -> vector<8x128xf32>
    %c0_3 = arith.constant 0 : index
    %c0_4 = arith.constant 0 : index
    %c0_5 = arith.constant 0 : index
    %9 = vector.load %arg2[%c0_3, %c0_4, %c0_5] : memref<2x8x128xf32, #tpu.memory_space<vmem>>, vector<1x8x128xf32>
    %10 = vector.shape_cast %9 : vector<1x8x128xf32> to vector<8x128xf32>
    %c0_6 = arith.constant 0 : index
    %c0_7 = arith.constant 0 : index
    %c0_8 = arith.constant 0 : index
    %11 = vector.load %arg3[%c0_6, %c0_7, %c0_8] : memref<2x8x128xf32, #tpu.memory_space<vmem>>, vector<1x8x128xf32>
    %12 = vector.shape_cast %11 : vector<1x8x128xf32> to vector<8x128xf32>
    %c1 = arith.constant 1 : index
    %c0_9 = arith.constant 0 : index
    %c0_10 = arith.constant 0 : index
    %13 = vector.load %arg2[%c1, %c0_9, %c0_10] : memref<2x8x128xf32, #tpu.memory_space<vmem>>, vector<1x8x128xf32>
    %14 = vector.shape_cast %13 : vector<1x8x128xf32> to vector<8x128xf32>
    %c1_11 = arith.constant 1 : index
    %c0_12 = arith.constant 0 : index
    %c0_13 = arith.constant 0 : index
    %15 = vector.load %arg3[%c1_11, %c0_12, %c0_13] : memref<2x8x128xf32, #tpu.memory_space<vmem>>, vector<1x8x128xf32>
    %16 = vector.shape_cast %15 : vector<1x8x128xf32> to vector<8x128xf32>
    %17 = tpu.concatenate %8, %10 in 1 : vector<8x128xf32>, vector<8x128xf32> -> vector<8x256xf32>
    %18 = arith.truncf %17 : vector<8x256xf32> to vector<8x256xbf16>
    %c0_14 = arith.constant 0 : index
    %c0_15 = arith.constant 0 : index
    %19 = vector.load %arg4[%c0_14, %c0_15] : memref<256x512xbf16, #tpu.memory_space<vmem>>, vector<256x512xbf16>
    %cst_16 = arith.constant dense<0.000000e+00> : vector<8x512xf32>
    %20 = tpu.matmul %18, %19, %cst_16 {dimension_numbers = #tpu.dot_dimension_numbers<[1], [0], [0], [1], [0, 0, 1, 1], [], []>} : vector<8x256xbf16>, vector<256x512xbf16>, vector<8x512xf32> -> vector<8x512xf32>
    %c0_17 = arith.constant 0 : index
    %c0_18 = arith.constant 0 : index
    %21 = vector.load %arg5[%c0_17, %c0_18] : memref<1x512xf32, #tpu.memory_space<vmem>>, vector<1x512xf32>
    %22 = vector.broadcast %21 : vector<1x512xf32> to vector<8x512xf32>
    %23 = arith.addf %20, %22 : vector<8x512xf32>
    %24 = vector.extract_strided_slice %23 {offsets = [0, 0], sizes = [8, 128], strides = [1, 1]} : vector<8x512xf32> to vector<8x128xf32>
    %cst_19 = arith.constant 5.000000e-01 : f32
    %25 = vector.broadcast %cst_19 : f32 to vector<8x128xf32>
    %26 = arith.mulf %25, %24 : vector<8x128xf32>
    %27 = math.tanh %26 : vector<8x128xf32>
    %cst_20 = arith.constant 5.000000e-01 : f32
    %28 = vector.broadcast %cst_20 : f32 to vector<8x128xf32>
    %29 = arith.mulf %28, %27 : vector<8x128xf32>
    %cst_21 = arith.constant 5.000000e-01 : f32
    %30 = vector.broadcast %cst_21 : f32 to vector<8x128xf32>
    %31 = arith.addf %29, %30 : vector<8x128xf32>
    %32 = vector.extract_strided_slice %23 {offsets = [0, 128], sizes = [8, 128], strides = [1, 1]} : vector<8x512xf32> to vector<8x128xf32>
    %cst_22 = arith.constant 5.000000e-01 : f32
    %33 = vector.broadcast %cst_22 : f32 to vector<8x128xf32>
    %34 = arith.mulf %33, %32 : vector<8x128xf32>
    %35 = math.tanh %34 : vector<8x128xf32>
    %cst_23 = arith.constant 5.000000e-01 : f32
    %36 = vector.broadcast %cst_23 : f32 to vector<8x128xf32>
    %37 = arith.mulf %36, %35 : vector<8x128xf32>
    %cst_24 = arith.constant 5.000000e-01 : f32
    %38 = vector.broadcast %cst_24 : f32 to vector<8x128xf32>
    %39 = arith.addf %37, %38 : vector<8x128xf32>
    %40 = vector.extract_strided_slice %23 {offsets = [0, 256], sizes = [8, 128], strides = [1, 1]} : vector<8x512xf32> to vector<8x128xf32>
    %41 = math.tanh %40 : vector<8x128xf32>
    %42 = vector.extract_strided_slice %23 {offsets = [0, 384], sizes = [8, 128], strides = [1, 1]} : vector<8x512xf32> to vector<8x128xf32>
    %cst_25 = arith.constant 5.000000e-01 : f32
    %43 = vector.broadcast %cst_25 : f32 to vector<8x128xf32>
    %44 = arith.mulf %43, %42 : vector<8x128xf32>
    %45 = math.tanh %44 : vector<8x128xf32>
    %cst_26 = arith.constant 5.000000e-01 : f32
    %46 = vector.broadcast %cst_26 : f32 to vector<8x128xf32>
    %47 = arith.mulf %46, %45 : vector<8x128xf32>
    %cst_27 = arith.constant 5.000000e-01 : f32
    %48 = vector.broadcast %cst_27 : f32 to vector<8x128xf32>
    %49 = arith.addf %47, %48 : vector<8x128xf32>
    %50 = arith.mulf %39, %12 : vector<8x128xf32>
    %51 = arith.mulf %31, %41 : vector<8x128xf32>
    %52 = arith.addf %50, %51 : vector<8x128xf32>
    %53 = math.tanh %52 : vector<8x128xf32>
    %54 = arith.mulf %49, %53 : vector<8x128xf32>
    %55 = tpu.concatenate %54, %14 in 1 : vector<8x128xf32>, vector<8x128xf32> -> vector<8x256xf32>
    %56 = arith.truncf %55 : vector<8x256xf32> to vector<8x256xbf16>
    %c0_28 = arith.constant 0 : index
    %c0_29 = arith.constant 0 : index
    %57 = vector.load %arg6[%c0_28, %c0_29] : memref<256x512xbf16, #tpu.memory_space<vmem>>, vector<256x512xbf16>
    %cst_30 = arith.constant dense<0.000000e+00> : vector<8x512xf32>
    %58 = tpu.matmul %56, %57, %cst_30 {dimension_numbers = #tpu.dot_dimension_numbers<[1], [0], [0], [1], [0, 0, 1, 1], [], []>} : vector<8x256xbf16>, vector<256x512xbf16>, vector<8x512xf32> -> vector<8x512xf32>
    %c0_31 = arith.constant 0 : index
    %c0_32 = arith.constant 0 : index
    %59 = vector.load %arg7[%c0_31, %c0_32] : memref<1x512xf32, #tpu.memory_space<vmem>>, vector<1x512xf32>
    %60 = vector.broadcast %59 : vector<1x512xf32> to vector<8x512xf32>
    %61 = arith.addf %58, %60 : vector<8x512xf32>
    %62 = vector.extract_strided_slice %61 {offsets = [0, 0], sizes = [8, 128], strides = [1, 1]} : vector<8x512xf32> to vector<8x128xf32>
    %cst_33 = arith.constant 5.000000e-01 : f32
    %63 = vector.broadcast %cst_33 : f32 to vector<8x128xf32>
    %64 = arith.mulf %63, %62 : vector<8x128xf32>
    %65 = math.tanh %64 : vector<8x128xf32>
    %cst_34 = arith.constant 5.000000e-01 : f32
    %66 = vector.broadcast %cst_34 : f32 to vector<8x128xf32>
    %67 = arith.mulf %66, %65 : vector<8x128xf32>
    %cst_35 = arith.constant 5.000000e-01 : f32
    %68 = vector.broadcast %cst_35 : f32 to vector<8x128xf32>
    %69 = arith.addf %67, %68 : vector<8x128xf32>
    %70 = vector.extract_strided_slice %61 {offsets = [0, 128], sizes = [8, 128], strides = [1, 1]} : vector<8x512xf32> to vector<8x128xf32>
    %cst_36 = arith.constant 5.000000e-01 : f32
    %71 = vector.broadcast %cst_36 : f32 to vector<8x128xf32>
    %72 = arith.mulf %71, %70 : vector<8x128xf32>
    %73 = math.tanh %72 : vector<8x128xf32>
    %cst_37 = arith.constant 5.000000e-01 : f32
    %74 = vector.broadcast %cst_37 : f32 to vector<8x128xf32>
    %75 = arith.mulf %74, %73 : vector<8x128xf32>
    %cst_38 = arith.constant 5.000000e-01 : f32
    %76 = vector.broadcast %cst_38 : f32 to vector<8x128xf32>
    %77 = arith.addf %75, %76 : vector<8x128xf32>
    %78 = vector.extract_strided_slice %61 {offsets = [0, 256], sizes = [8, 128], strides = [1, 1]} : vector<8x512xf32> to vector<8x128xf32>
    %79 = math.tanh %78 : vector<8x128xf32>
    %80 = vector.extract_strided_slice %61 {offsets = [0, 384], sizes = [8, 128], strides = [1, 1]} : vector<8x512xf32> to vector<8x128xf32>
    %cst_39 = arith.constant 5.000000e-01 : f32
    %81 = vector.broadcast %cst_39 : f32 to vector<8x128xf32>
    %82 = arith.mulf %81, %80 : vector<8x128xf32>
    %83 = math.tanh %82 : vector<8x128xf32>
    %cst_40 = arith.constant 5.000000e-01 : f32
    %84 = vector.broadcast %cst_40 : f32 to vector<8x128xf32>
    %85 = arith.mulf %84, %83 : vector<8x128xf32>
    %cst_41 = arith.constant 5.000000e-01 : f32
    %86 = vector.broadcast %cst_41 : f32 to vector<8x128xf32>
    %87 = arith.addf %85, %86 : vector<8x128xf32>
    %88 = arith.mulf %77, %16 : vector<8x128xf32>
    %89 = arith.mulf %69, %79 : vector<8x128xf32>
    %90 = arith.addf %88, %89 : vector<8x128xf32>
    %91 = math.tanh %90 : vector<8x128xf32>
    %92 = arith.mulf %87, %91 : vector<8x128xf32>
    %93 = arith.truncf %92 : vector<8x128xf32> to vector<8x128xbf16>
    %c0_42 = arith.constant 0 : index
    %c0_43 = arith.constant 0 : index
    %94 = vector.load %arg8[%c0_42, %c0_43] : memref<128x256xbf16, #tpu.memory_space<vmem>>, vector<128x256xbf16>
    %cst_44 = arith.constant dense<0.000000e+00> : vector<8x256xf32>
    %95 = tpu.matmul %93, %94, %cst_44 {dimension_numbers = #tpu.dot_dimension_numbers<[1], [0], [0], [1], [0, 0, 1, 1], [], []>} : vector<8x128xbf16>, vector<128x256xbf16>, vector<8x256xf32> -> vector<8x256xf32>
    %c0_45 = arith.constant 0 : index
    %c0_46 = arith.constant 0 : index
    %96 = vector.load %arg9[%c0_45, %c0_46] : memref<1x256xf32, #tpu.memory_space<vmem>>, vector<1x256xf32>
    %97 = vector.broadcast %96 : vector<1x256xf32> to vector<8x256xf32>
    %98 = arith.addf %95, %97 : vector<8x256xf32>
    %c0_47 = arith.constant 0 : index
    %c0_48 = arith.constant 0 : index
    %99 = vector.load %arg10[%c0_47, %c0_48] : memref<8x256xf32, #tpu.memory_space<vmem>>, vector<8x256xf32>
    tpu.vector_store %arg10[%c0_47, %c0_48], %98 {strides = array<i32>} : memref<8x256xf32, #tpu.memory_space<vmem>>, vector<8x256xf32>,
    %c0_49 = arith.constant 0 : index
    %c0_50 = arith.constant 0 : index
    %c0_51 = arith.constant 0 : index
    %100 = vector.load %arg11[%c0_49, %c0_50, %c0_51] : memref<2x8x128xf32, #tpu.memory_space<vmem>>, vector<1x8x128xf32>
    %101 = vector.shape_cast %100 : vector<1x8x128xf32> to vector<8x128xf32>
    %102 = vector.shape_cast %54 : vector<8x128xf32> to vector<1x8x128xf32>
    tpu.vector_store %arg11[%c0_49, %c0_50, %c0_51], %102 {strides = array<i32>} : memref<2x8x128xf32, #tpu.memory_space<vmem>>, vector<1x8x128xf32>,
    %c1_52 = arith.constant 1 : index
    %c0_53 = arith.constant 0 : index
    %c0_54 = arith.constant 0 : index
    %103 = vector.load %arg11[%c1_52, %c0_53, %c0_54] : memref<2x8x128xf32, #tpu.memory_space<vmem>>, vector<1x8x128xf32>
    %104 = vector.shape_cast %103 : vector<1x8x128xf32> to vector<8x128xf32>
    %105 = vector.shape_cast %92 : vector<8x128xf32> to vector<1x8x128xf32>
    tpu.vector_store %arg11[%c1_52, %c0_53, %c0_54], %105 {strides = array<i32>} : memref<2x8x128xf32, #tpu.memory_space<vmem>>, vector<1x8x128xf32>,
    %c0_55 = arith.constant 0 : index
    %c0_56 = arith.constant 0 : index
    %c0_57 = arith.constant 0 : index
    %106 = vector.load %arg12[%c0_55, %c0_56, %c0_57] : memref<2x8x128xf32, #tpu.memory_space<vmem>>, vector<1x8x128xf32>
    %107 = vector.shape_cast %106 : vector<1x8x128xf32> to vector<8x128xf32>
    %108 = vector.shape_cast %52 : vector<8x128xf32> to vector<1x8x128xf32>
    tpu.vector_store %arg12[%c0_55, %c0_56, %c0_57], %108 {strides = array<i32>} : memref<2x8x128xf32, #tpu.memory_space<vmem>>, vector<1x8x128xf32>,
    %c1_58 = arith.constant 1 : index
    %c0_59 = arith.constant 0 : index
    %c0_60 = arith.constant 0 : index
    %109 = vector.load %arg12[%c1_58, %c0_59, %c0_60] : memref<2x8x128xf32, #tpu.memory_space<vmem>>, vector<1x8x128xf32>
    %110 = vector.shape_cast %109 : vector<1x8x128xf32> to vector<8x128xf32>
    %111 = vector.shape_cast %90 : vector<8x128xf32> to vector<1x8x128xf32>
    tpu.vector_store %arg12[%c1_58, %c0_59, %c0_60], %111 {strides = array<i32>} : memref<2x8x128xf32, #tpu.memory_space<vmem>>, vector<1x8x128xf32>,
    return
  }
}

</mosaic_0001>

<bundles_post_ra>
// kernel: decoder_step.1
= control target key start
LH: loop header
LB: loop body
LE: loop exit
PB: predicated region body
PF: predicated region fallthrough
CT: control target
= control target key end

     0   :  { %18 = vsyncpa [#allocation3], 0  ;;  %s2454_s0 = inlined_call_operand.vmem [shape: s32[8,1], index: 0, kind: input, shape index: {}]   ;;  %s2455_s1 = inlined_call_operand.hbm [shape: bf16[256,128], index: 1, kind: input, shape index: {}]   ;;  %s2456_s2 = inlined_call_operand.hbm [shape: f32[2,8,128], index: 2, kind: input, shape index: {}, may-alias: {2,11}]   ;;  %s2457_s3 = inlined_call_operand.hbm [shape: f32[2,8,128], index: 3, kind: input, shape index: {}, may-alias: {3,12}]   ;;  %s2458_s4 = inlined_call_operand.hbm [shape: bf16[256,512], index: 4, kind: input, shape index: {}]   ;;  %s2459_s5 = inlined_call_operand.vmem [shape: f32[1,512], index: 5, kind: input, shape index: {}]   ;;  %s2460_s6 = inlined_call_operand.hbm [shape: bf16[256,512], index: 6, kind: input, shape index: {}]   ;;  %s2461_s7 = inlined_call_operand.vmem [shape: f32[1,512], index: 7, kind: input, shape index: {}]   ;;  %s2462_s8 = inlined_call_operand.hbm [shape: bf16[128,256], index: 8, kind: input, shape index: {}]   ;;  %s2463_s9 = inlined_call_operand.vmem [shape: f32[1,256], index: 9, kind: input, shape index: {}]   ;;  %s2464_s10 = inlined_call_operand.hbm [shape: f32[8,256], index: 10, kind: output, shape index: {0}]   ;;  %s2465_s11 = inlined_call_operand.hbm [shape: f32[2,8,128], index: 11, kind: output, shape index: {1}, may-alias: {2,11}]   ;;  %s2466_s12 = inlined_call_operand.hbm [shape: f32[2,8,128], index: 12, kind: output, shape index: {2}, may-alias: {3,12}]  }
   0x1   :  { %19 = vsyncpa [#allocation6], 0 }
   0x2   :  { %20 = vsyncpa [#allocation9], 0 }
   0x3   :  { %21 = vsyncpa [#allocation12], 0 }
   0x4   :  { %22 = vsyncpa [#allocation4], 0 }
   0x5   :  { %23 = vsyncpa [#allocation15], 0  ;;  %s2203_s21 = smov [#allocation5]   ;;  %s1993_s25 = scalar_lea.hbm %s2456_s2, 256 }
   0x6   :  { %s43_s22 = sshll.u32 %s2203_s21, 4  ;;  %p1994_p0 = scmp.ne.s32.totalorder %s2456_s2, %s1993_s25  ;;  %s44_s22 = int_to_ptr.vmem [resolvable:$true] %s43_s22 }
   0x7   :  { %p1997_p1 = scmp.lt.u32.totalorder %s1993_s25, %s2456_s2 }
   0x9   :  { %p1999_p2 = pnand %p1997_p1, %p1994_p0 }
   0xb   :  { %2002 = shalt.err (!%p1999_p2)
}
   0xc   :  { %s2003_s30 = scalar_lea.vmem %s44_s22, 256  ;;  %p2008_p4 = scmp.lt.s32.totalorder %s44_s22, %s44_s22 }
   0xd   :  { %p2004_p3 = scmp.ne.s32.totalorder %s44_s22, %s2003_s30  ;;  %p2009_p5 = scmp.lt.s32.totalorder %s2003_s30, %s2003_s30 }
   0xf   :  { %p2010_p6 = por %p2009_p5, %p2008_p4 }
  0x11   :  { %p2011_p7 = pnand %p2010_p6, %p2004_p3 }
  0x13   :  { %2014 = shalt.err (!%p2011_p7)
}
  0x14   :  { %s2204_s13 = smov 128   ;;  %s2205_s14 = smov 8  }
  0x15   :  { %49 = dma.hbm_to_vmem [thread:$0]  %s2456_s2, 256, %s44_s22, [#allocation6], %s2204_s13, %s2204_s13, %s2205_s14  }
  0x16   :  { %s2206_s17 = smov [#allocation8]   ;;  %s2015_s21 = scalar_lea.hbm %s2458_s4, 8192 }
  0x17   :  { %s67_s18 = sshll.u32 %s2206_s17, 4  ;;  %p2016_p8 = scmp.ne.s32.totalorder %s2458_s4, %s2015_s21  ;;  %s68_s18 = int_to_ptr.vmem [resolvable:$true] %s67_s18 }
  0x18   :  { %p2019_p9 = scmp.lt.u32.totalorder %s2015_s21, %s2458_s4 }
  0x1a   :  { %p2021_p10 = pnand %p2019_p9, %p2016_p8 }
  0x1c   :  { %2024 = shalt.err (!%p2021_p10)
}
  0x1d   :  { %s2025_s27 = scalar_lea.vmem %s68_s18, 8192  ;;  %p2030_p12 = scmp.lt.s32.totalorder %s68_s18, %s68_s18 }
  0x1e   :  { %p2026_p11 = scmp.ne.s32.totalorder %s68_s18, %s2025_s27  ;;  %p2031_p13 = scmp.lt.s32.totalorder %s2025_s27, %s2025_s27 }
  0x20   :  { %p2032_p0 = por %p2031_p13, %p2030_p12 }
  0x22   :  { %p2033_p1 = pnand %p2032_p0, %p2026_p11 }
  0x24   :  { %2036 = shalt.err (!%p2033_p1)
}
  0x25   :  { %s2207_s2 = smov 256   ;;  %s2208_s22 = smov 16  }
  0x26   :  { %73 = dma.hbm_to_vmem [thread:$0]  %s2458_s4, 8192, %s68_s18, [#allocation9], %s2207_s2, %s2207_s2, %s2208_s22  }
  0x27   :  { %s2209_s30 = smov [#allocation2]   ;;  %s2037_s19 = scalar_lea.hbm %s2455_s1, 2048 }
  0x28   :  { %s31_s15 = sshll.u32 %s2209_s30, 4  ;;  %p2038_p2 = scmp.ne.s32.totalorder %s2455_s1, %s2037_s19  ;;  %s32_s15 = int_to_ptr.vmem [resolvable:$true] %s31_s15 }
  0x29   :  { %p2041_p3 = scmp.lt.u32.totalorder %s2037_s19, %s2455_s1 }
  0x2b   :  { %p2043_p4 = pnand %p2041_p3, %p2038_p2 }
  0x2d   :  { %2046 = shalt.err (!%p2043_p4)
}
  0x2e   :  { %s2047_s25 = scalar_lea.vmem %s32_s15, 2048  ;;  %p2052_p6 = scmp.lt.s32.totalorder %s32_s15, %s32_s15 }
  0x2f   :  { %p2048_p5 = scmp.ne.s32.totalorder %s32_s15, %s2047_s25  ;;  %p2053_p7 = scmp.lt.s32.totalorder %s2047_s25, %s2047_s25 }
  0x31   :  { %p2054_p8 = por %p2053_p7, %p2052_p6 }
  0x33   :  { %p2055_p9 = pnand %p2054_p8, %p2048_p5 }
  0x35   :  { %2058 = shalt.err (!%p2055_p9)
}
  0x36   :  { %s2210_s4 = smov 64   ;;  %s2211_s18 = smov 4  }
  0x37   :  { %37 = dma.hbm_to_vmem [thread:$0]  %s2455_s1, 2048, %s32_s15, [#allocation3], %s2210_s4, %s2210_s4, %s2211_s18  }
  0x38   :  { %s2212_s28 = smov [#allocation7]   ;;  %s2213_s30 = smov [#allocation10]  }
  0x39   :  { %s55_s29 = sshll.u32 %s2212_s28, 4  ;;  %s81_s16 = sshll.u32 %s2213_s30, 4  ;;  %s56_s29 = int_to_ptr.vmem [resolvable:$true] %s55_s29  ;;  %s82_s16 = int_to_ptr.vmem [resolvable:$true] %s81_s16 }
  0x3a   :  { %s2059_s20 = scalar_lea.hbm %s2457_s3, 256 }
  0x3b   :  { %p2060_p10 = scmp.ne.s32.totalorder %s2457_s3, %s2059_s20  ;;  %p2063_p11 = scmp.lt.u32.totalorder %s2059_s20, %s2457_s3 }
  0x3d   :  { %p2065_p12 = pnand %p2063_p11, %p2060_p10 }
  0x3f   :  { %2068 = shalt.err (!%p2065_p12)
}
  0x40   :  { %s2069_s1 = scalar_lea.vmem %s56_s29, 256  ;;  %p2074_p0 = scmp.lt.s32.totalorder %s56_s29, %s56_s29 }
  0x41   :  { %p2070_p13 = scmp.ne.s32.totalorder %s56_s29, %s2069_s1  ;;  %p2075_p1 = scmp.lt.s32.totalorder %s2069_s1, %s2069_s1 }
  0x43   :  { %p2076_p2 = por %p2075_p1, %p2074_p0 }
  0x45   :  { %p2077_p3 = pnand %p2076_p2, %p2070_p13 }
  0x47   :  { %2080 = shalt.err (!%p2077_p3)
}
  0x48   :  { %61 = dma.hbm_to_vmem [thread:$0]  %s2457_s3, 256, %s56_s29, [#allocation6], %s2204_s13, %s2204_s13, %s2205_s14  }
  0x49   :  { %s2081_s27 = scalar_lea.hbm %s2460_s6, 8192 }
  0x4a   :  { %p2082_p4 = scmp.ne.s32.totalorder %s2460_s6, %s2081_s27  ;;  %p2085_p5 = scmp.lt.u32.totalorder %s2081_s27, %s2460_s6 }
  0x4c   :  { %p2087_p6 = pnand %p2085_p5, %p2082_p4 }
  0x4e   :  { %2090 = shalt.err (!%p2087_p6)
}
  0x4f   :  { %s2091_s20 = scalar_lea.vmem %s82_s16, 8192  ;;  %p2096_p8 = scmp.lt.s32.totalorder %s82_s16, %s82_s16 }
  0x50   :  { %p2092_p7 = scmp.ne.s32.totalorder %s82_s16, %s2091_s20  ;;  %p2097_p9 = scmp.lt.s32.totalorder %s2091_s20, %s2091_s20 }
  0x52   :  { %p2098_p10 = por %p2097_p9, %p2096_p8 }
  0x54   :  { %p2099_p11 = pnand %p2098_p10, %p2092_p7 }
  0x56   :  { %2102 = shalt.err (!%p2099_p11)
}
  0x57   :  { %87 = dma.hbm_to_vmem [thread:$0]  %s2460_s6, 8192, %s82_s16, [#allocation9], %s2207_s2, %s2207_s2, %s2208_s22  }
  0x58   :  { %s2214_s21 = smov [#allocation11]   ;;  %s2103_s1 = scalar_lea.hbm %s2462_s8, 2048 }
  0x59   :  { %s95_s23 = sshll.u32 %s2214_s21, 4  ;;  %p2104_p12 = scmp.ne.s32.totalorder %s2462_s8, %s2103_s1  ;;  %s96_s23 = int_to_ptr.vmem [resolvable:$true] %s95_s23 }
  0x5a   :  { %p2107_p13 = scmp.lt.u32.totalorder %s2103_s1, %s2462_s8 }
  0x5c   :  { %p2109_p0 = pnand %p2107_p13, %p2104_p12 }
  0x5e   :  { %2112 = shalt.err (!%p2109_p0)
}
  0x5f   :  { %s2113_s27 = scalar_lea.vmem %s96_s23, 2048  ;;  %p2118_p2 = scmp.lt.s32.totalorder %s96_s23, %s96_s23 }
  0x60   :  { %p2114_p1 = scmp.ne.s32.totalorder %s96_s23, %s2113_s27  ;;  %p2119_p3 = scmp.lt.s32.totalorder %s2113_s27, %s2113_s27 }
  0x62   :  { %p2120_p4 = por %p2119_p3, %p2118_p2 }
  0x64   :  { %p2121_p5 = pnand %p2120_p4, %p2114_p1 }
  0x66   :  { %2124 = shalt.err (!%p2121_p5)
}
  0x67   :  { %101 = dma.hbm_to_vmem [thread:$0]  %s2462_s8, 2048, %s96_s23, [#allocation12], %s2204_s13, %s2204_s13, %s2205_s14  }
  0x68   :  { %2191 = dma.done.wait [#allocation3], 2048  }
  0x69   :  { %2192 = vsyncadd [#allocation3], 4294965248 }
  0x6a   :  { %2193 = dma.done.wait [#allocation6], 512  }
  0x6b   :  { %2194 = vsyncadd [#allocation6], 4294966784 }
  0x6c   :  { %2195 = dma.done.wait [#allocation9], 16384  }
  0x6d   :  { %2196 = vsyncadd [#allocation9], 4294950912 }
  0x6e   :  { %2197 = dma.done.wait [#allocation12], 2048  }
  0x6f   :  { %2198 = vsyncadd [#allocation12], 4294965248  ;;  %v2215_v0 = vmov 0   ;;  %v123_v1 = vld [vmem:[%s2454_s0] sm:$0xff]  ;;  %v1743_v4 = vld [vmem:[#allocation2 + $0x48] sm:$0xff]   ;;  %v124_v49 = vlaneseq }
  0x70   :  { %1740 = vset.pattern.permute.xlu0 %v2215_v0  ;;  %v1741_v2 = vld [vmem:[#allocation2 + $0x40] sm:$0xff]   ;;  %v1744_v5 = vld [vmem:[#allocation2 + $0x8] sm:$0xff]   ;;  %v1745_v6 = vld [vmem:[#allocation2 + $0x50] sm:$0xff]   ;;  %v2216_v55 = vmov 1.0|1.0  }
  0x71   :  { %128 = vperm.xlu0 %1740, %v123_v1   ;;  %v1742_v3 = vld [vmem:[#allocation2] sm:$0xff]   ;;  %1701 = vmatprep.subr.bf16.mxu0 %v1741_v2  ;;  %v1746_v7 = vld [vmem:[#allocation2 + $0x10] sm:$0xff]   ;;  %v1747_v8 = vld [vmem:[#allocation2 + $0x58] sm:$0xff]   ;;  %v125_v50 = vand.u32 127, %v124_v49 }
  0x72   :  { %1702 = vmatpush3.bf16.msra.mxu0 %v1742_v3  ;;  %v1748_v9 = vld [vmem:[#allocation2 + $0x18] sm:$0xff]   ;;  %v1749_v10 = vld [vmem:[#allocation2 + $0x60] sm:$0xff]   ;;  %v1751_v12 = vld [vmem:[#allocation2 + $0x68] sm:$0xff]  }
  0x73   :  { %1703 = vmatprep.subr.bf16.mxu0 %v1743_v4  ;;  %v1750_v11 = vld [vmem:[#allocation2 + $0x20] sm:$0xff]   ;;  %v1752_v16 = vld [vmem:[#allocation2 + $0x28] sm:$0xff]   ;;  %v1753_v17 = vld [vmem:[#allocation2 + $0x70] sm:$0xff]   ;;  %v126_v51 = vadd.s32 128, %v125_v50 }
  0x74   :  { %v1757_v13 = vld [vmem:[#allocation8 + $0x4] ss:$16 sps:$4 sm:$0xff]   ;;  %v1762_v14 = vld [vmem:[#allocation8] ss:$16 sps:$4 sm:$0xff]   ;;  %v1755_v21 = vld [vmem:[#allocation2 + $0x78] sm:$0xff]  }
  0x75   :  { %720 = vmatprep.subr.bf16.mxu1 %v1757_v13  ;;  %v1763_v15 = vld [vmem:[#allocation8 + $0x24] ss:$16 sps:$4 sm:$0xff]   ;;  %v1768_v18 = vld [vmem:[#allocation8 + $0x20] ss:$16 sps:$4 sm:$0xff]   ;;  %v1756_v24 = vld [vmem:[#allocation2 + $0x38] sm:$0xff]  }
  0x76   :  { %1704 = vmatpush3.bf16.msra.mxu0 %v1744_v5  ;;  %721 = vmatpush1.bf16.msra.mxu1 %v1762_v14  ;;  %v1769_v19 = vld [vmem:[#allocation8 + $0x44] ss:$16 sps:$4 sm:$0xff]   ;;  %v1774_v22 = vld [vmem:[#allocation8 + $0x40] ss:$16 sps:$4 sm:$0xff]   ;;  %v1761_v26 = vld [vmem:[#allocation8 + $0xc] ss:$16 sps:$4 sm:$0xff]  }
  0x77   :  { %1705 = vmatprep.subr.bf16.mxu0 %v1745_v6  ;;  %722 = vmatprep.subr.bf16.mxu1 %v1763_v15  ;;  %v1754_v20 = vld [vmem:[#allocation2 + $0x30] sm:$0xff]   ;;  %v1759_v53 = vld [vmem:[#allocation8 + $0x8] ss:$16 sps:$4 sm:$0xff]   ;;  %v1767_v54 = vld [vmem:[#allocation8 + $0x2c] ss:$16 sps:$4 sm:$0xff]  }
  0x78   :  { %v1775_v23 = vld [vmem:[#allocation8 + $0x64] ss:$16 sps:$4 sm:$0xff]   ;;  %v1780_v25 = vld [vmem:[#allocation8 + $0x60] ss:$16 sps:$4 sm:$0xff]   ;;  %v1765_v56 = vld [vmem:[#allocation8 + $0x28] ss:$16 sps:$4 sm:$0xff]  }
  0x79   :  { %v1781_v27 = vld [vmem:[#allocation8 + $0x84] ss:$16 sps:$4 sm:$0xff]   ;;  %v1786_v28 = vld [vmem:[#allocation8 + $0x80] ss:$16 sps:$4 sm:$0xff]   ;;  %v1773_v57 = vld [vmem:[#allocation8 + $0x4c] ss:$16 sps:$4 sm:$0xff]  }
  0x7a   :  { %1706 = vmatpush3.bf16.msra.mxu0 %v1746_v7  ;;  %723 = vmatpush1.bf16.msra.mxu1 %v1768_v18  ;;  %v1787_v29 = vld [vmem:[#allocation8 + $0xa4] ss:$16 sps:$4 sm:$0xff]   ;;  %v1792_v30 = vld [vmem:[#allocation8 + $0xa0] ss:$16 sps:$4 sm:$0xff]   ;;  %v1771_v58 = vld [vmem:[#allocation8 + $0x48] ss:$16 sps:$4 sm:$0xff]  }
  0x7b   :  { %1707 = vmatprep.subr.bf16.mxu0 %v1747_v8  ;;  %724 = vmatprep.subr.bf16.mxu1 %v1769_v19  ;;  %v1793_v31 = vld [vmem:[#allocation8 + $0xc4] ss:$16 sps:$4 sm:$0xff]   ;;  %v1798_v32 = vld [vmem:[#allocation8 + $0xc0] ss:$16 sps:$4 sm:$0xff]   ;;  %v1779_v59 = vld [vmem:[#allocation8 + $0x6c] ss:$16 sps:$4 sm:$0xff]  }
  0x7c   :  { %v1799_v33 = vld [vmem:[#allocation8 + $0xe4] ss:$16 sps:$4 sm:$0xff]   ;;  %v1804_v34 = vld [vmem:[#allocation8 + $0xe0] ss:$16 sps:$4 sm:$0xff]   ;;  %v1777_v60 = vld [vmem:[#allocation8 + $0x68] ss:$16 sps:$4 sm:$0xff]  }
  0x7d   :  { %v1805_v35 = vld [vmem:[#allocation8 + $0x104] ss:$16 sps:$4 sm:$0xff]   ;;  %v1810_v36 = vld [vmem:[#allocation8 + $0x100] ss:$16 sps:$4 sm:$0xff]   ;;  %v1785_v61 = vld [vmem:[#allocation8 + $0x8c] ss:$16 sps:$4 sm:$0xff]  }
  0x7e   :  { %1708 = vmatpush3.bf16.msra.mxu0 %v1748_v9  ;;  %725 = vmatpush1.bf16.msra.mxu1 %v1774_v22  ;;  %v1811_v37 = vld [vmem:[#allocation8 + $0x124] ss:$16 sps:$4 sm:$0xff]   ;;  %v1816_v38 = vld [vmem:[#allocation8 + $0x120] ss:$16 sps:$4 sm:$0xff]   ;;  %v1783_v62 = vld [vmem:[#allocation8 + $0x88] ss:$16 sps:$4 sm:$0xff]  }
  0x7f   :  { %1709 = vmatprep.subr.bf16.mxu0 %v1749_v10  ;;  %726 = vmatprep.subr.bf16.mxu1 %v1775_v23  ;;  %v1817_v39 = vld [vmem:[#allocation8 + $0x144] ss:$16 sps:$4 sm:$0xff]   ;;  %v1822_v40 = vld [vmem:[#allocation8 + $0x140] ss:$16 sps:$4 sm:$0xff]   ;;  %v1791_v63 = vld [vmem:[#allocation8 + $0xac] ss:$16 sps:$4 sm:$0xff]  }
  0x80   :  { %v1823_v41 = vld [vmem:[#allocation8 + $0x164] ss:$16 sps:$4 sm:$0xff]   ;;  %v1828_v42 = vld [vmem:[#allocation8 + $0x160] ss:$16 sps:$4 sm:$0xff]   ;;  %v1789_v1 = vld [vmem:[#allocation8 + $0xa8] ss:$16 sps:$4 sm:$0xff]  }
  0x81   :  { %v1829_v43 = vld [vmem:[#allocation8 + $0x184] ss:$16 sps:$4 sm:$0xff]   ;;  %v1834_v44 = vld [vmem:[#allocation8 + $0x180] ss:$16 sps:$4 sm:$0xff]   ;;  %v1797_v2 = vld [vmem:[#allocation8 + $0xcc] ss:$16 sps:$4 sm:$0xff]  }
  0x82   :  { %1710 = vmatpush3.bf16.msra.mxu0 %v1750_v11  ;;  %727 = vmatpush1.bf16.msra.mxu1 %v1780_v25  ;;  %v1835_v45 = vld [vmem:[#allocation8 + $0x1a4] ss:$16 sps:$4 sm:$0xff]   ;;  %v1840_v46 = vld [vmem:[#allocation8 + $0x1a0] ss:$16 sps:$4 sm:$0xff]   ;;  %v1795_v3 = vld [vmem:[#allocation8 + $0xc8] ss:$16 sps:$4 sm:$0xff]  }
  0x83   :  { %1711 = vmatprep.subr.bf16.mxu0 %v1751_v12  ;;  %728 = vmatprep.subr.bf16.mxu1 %v1781_v27  ;;  %v1841_v47 = vld [vmem:[#allocation8 + $0x1c4] ss:$16 sps:$4 sm:$0xff]   ;;  %v1846_v48 = vld [vmem:[#allocation8 + $0x1c0] ss:$16 sps:$4 sm:$0xff]   ;;  %v1803_v4 = vld [vmem:[#allocation8 + $0xec] ss:$16 sps:$4 sm:$0xff]  }
  0x84   :  { %v1801_v5 = vld [vmem:[#allocation8 + $0xe8] ss:$16 sps:$4 sm:$0xff]   ;;  %v1809_v6 = vld [vmem:[#allocation8 + $0x10c] ss:$16 sps:$4 sm:$0xff]   ;;  %v1852_v23 = vld [vmem:[#allocation8 + $0x1e0] ss:$16 sps:$4 sm:$0xff]  }
  0x85   :  { %v1807_v7 = vld [vmem:[#allocation8 + $0x108] ss:$16 sps:$4 sm:$0xff]   ;;  %v1815_v8 = vld [vmem:[#allocation8 + $0x12c] ss:$16 sps:$4 sm:$0xff]  }
  0x86   :  { %1712 = vmatpush3.bf16.msra.mxu0 %v1752_v16  ;;  %729 = vmatpush1.bf16.msra.mxu1 %v1786_v28  ;;  %v1813_v9 = vld [vmem:[#allocation8 + $0x128] ss:$16 sps:$4 sm:$0xff]   ;;  %v1821_v10 = vld [vmem:[#allocation8 + $0x14c] ss:$16 sps:$4 sm:$0xff]  }
  0x87   :  { %1713 = vmatprep.subr.bf16.mxu0 %v1753_v17  ;;  %730 = vmatprep.subr.bf16.mxu1 %v1787_v29  ;;  %v1819_v11 = vld [vmem:[#allocation8 + $0x148] ss:$16 sps:$4 sm:$0xff]   ;;  %v1827_v12 = vld [vmem:[#allocation8 + $0x16c] ss:$16 sps:$4 sm:$0xff]  }
  0x88   :  { %v1825_v13 = vld [vmem:[#allocation8 + $0x168] ss:$16 sps:$4 sm:$0xff]   ;;  %v1833_v14 = vld [vmem:[#allocation8 + $0x18c] ss:$16 sps:$4 sm:$0xff]  }
  0x89   :  { %v1831_v15 = vld [vmem:[#allocation8 + $0x188] ss:$16 sps:$4 sm:$0xff]   ;;  %v1839_v16 = vld [vmem:[#allocation8 + $0x1ac] ss:$16 sps:$4 sm:$0xff]  }
  0x8a   :  { %1714 = vmatpush3.bf16.msra.mxu0 %v1754_v20  ;;  %731 = vmatpush1.bf16.msra.mxu1 %v1792_v30  ;;  %v1837_v17 = vld [vmem:[#allocation8 + $0x1a8] ss:$16 sps:$4 sm:$0xff]   ;;  %v1845_v18 = vld [vmem:[#allocation8 + $0x1cc] ss:$16 sps:$4 sm:$0xff]   ;;  %v1847_v20 = vld [vmem:[#allocation8 + $0x1e4] ss:$16 sps:$4 sm:$0xff]  }
  0x8b   :  { %1715 = vmatprep.subr.bf16.mxu0 %v1755_v21  ;;  %732 = vmatprep.subr.bf16.mxu1 %v1793_v31  ;;  %v1843_v19 = vld [vmem:[#allocation8 + $0x1c8] ss:$16 sps:$4 sm:$0xff]   ;;  %v1851_v21 = vld [vmem:[#allocation8 + $0x1ec] ss:$16 sps:$4 sm:$0xff]  }
  0x8c   :  { %v1849_v22 = vld [vmem:[#allocation8 + $0x1e8] ss:$16 sps:$4 sm:$0xff]   ;;  %v1858_v27 = vld [vmem:[#allocation10 + $0xc] ss:$16 sps:$4 sm:$0xff]  }
  0x8e   :  { %1716 = vmatpush3.bf16.msra.mxu0 %v1756_v24  ;;  %733 = vmatpush1.bf16.msra.mxu1 %v1798_v32  ;;  %v306_v24 = vld [vmem:[#allocation5] sm:$0xff] }
  0x8f   :  { %761 = vmatprep.subr.bf16.mxu0 %v1761_v26  ;;  %734 = vmatprep.subr.bf16.mxu1 %v1799_v33  ;;  %v313_v25 = vpack.c.bf16 %v306_v24, %v306_v24  ;;  %v1855_v26 = vld [vmem:[#allocation10 + $0x4] ss:$16 sps:$4 sm:$0xff]   ;;  %v1853_v33 = vld [vmem:[#allocation10] ss:$16 sps:$4 sm:$0xff]  }
  0x90   :  { %v1931_v24 = vld [vmem:[#allocation10 + $0x1a0] ss:$16 sps:$4 sm:$0xff]  }
  0x91   :  { %752 = vmatprep.mubr.bf16.mxu1 %v313_v25 }
  0x92   :  { %735 = vmatpush1.bf16.msra.mxu1 %v1804_v34  ;;  %v1856_v34 = vld [vmem:[#allocation10 + $0x8] ss:$16 sps:$4 sm:$0xff]  }
  0x93   :  { %736 = vmatprep.subr.bf16.mxu1 %v1805_v35 }
  0x96   :  { %737 = vmatpush1.bf16.msra.mxu1 %v1810_v36  ;;  %v1861_v36 = vld [vmem:[#allocation10 + $0x24] ss:$16 sps:$4 sm:$0xff]  }
  0x97   :  { %738 = vmatprep.subr.bf16.mxu1 %v1811_v37  ;;  %v1864_v37 = vld [vmem:[#allocation10 + $0x2c] ss:$16 sps:$4 sm:$0xff]  }
  0x9a   :  { %739 = vmatpush1.bf16.msra.mxu1 %v1816_v38  ;;  %v1859_v38 = vld [vmem:[#allocation10 + $0x20] ss:$16 sps:$4 sm:$0xff]  }
  0x9b   :  { %740 = vmatprep.subr.bf16.mxu1 %v1817_v39  ;;  %v1862_v39 = vld [vmem:[#allocation10 + $0x28] ss:$16 sps:$4 sm:$0xff]  }
  0x9e   :  { %741 = vmatpush1.bf16.msra.mxu1 %v1822_v40  ;;  %v1867_v40 = vld [vmem:[#allocation10 + $0x44] ss:$16 sps:$4 sm:$0xff]  }
  0x9f   :  { %742 = vmatprep.subr.bf16.mxu1 %v1823_v41  ;;  %v1870_v41 = vld [vmem:[#allocation10 + $0x4c] ss:$16 sps:$4 sm:$0xff]  }
  0xa2   :  { %743 = vmatpush1.bf16.msra.mxu1 %v1828_v42  ;;  %v1865_v42 = vld [vmem:[#allocation10 + $0x40] ss:$16 sps:$4 sm:$0xff]  }
  0xa3   :  { %744 = vmatprep.subr.bf16.mxu1 %v1829_v43  ;;  %v1868_v43 = vld [vmem:[#allocation10 + $0x48] ss:$16 sps:$4 sm:$0xff]  }
  0xa6   :  { %745 = vmatpush1.bf16.msra.mxu1 %v1834_v44  ;;  %v1873_v44 = vld [vmem:[#allocation10 + $0x64] ss:$16 sps:$4 sm:$0xff]  }
  0xa7   :  { %746 = vmatprep.subr.bf16.mxu1 %v1835_v45  ;;  %v1876_v45 = vld [vmem:[#allocation10 + $0x6c] ss:$16 sps:$4 sm:$0xff]  }
  0xaa   :  { %747 = vmatpush1.bf16.msra.mxu1 %v1840_v46  ;;  %v1871_v46 = vld [vmem:[#allocation10 + $0x60] ss:$16 sps:$4 sm:$0xff]  }
  0xab   :  { %748 = vmatprep.subr.bf16.mxu1 %v1841_v47  ;;  %v1874_v47 = vld [vmem:[#allocation10 + $0x68] ss:$16 sps:$4 sm:$0xff]  }
  0xae   :  { %749 = vmatpush1.bf16.msra.mxu1 %v1846_v48  ;;  %v1879_v48 = vld [vmem:[#allocation10 + $0x84] ss:$16 sps:$4 sm:$0xff]  }
  0xaf   :  { %750 = vmatprep.subr.bf16.mxu1 %v1847_v20  ;;  %v1925_v20 = vld [vmem:[#allocation10 + $0x180] ss:$16 sps:$4 sm:$0xff]  }
  0xb2   :  { %751 = vmatpush1.bf16.msra.mxu1 %v1852_v23  ;;  %v1936_v23 = vld [vmem:[#allocation10 + $0x1ac] ss:$16 sps:$4 sm:$0xff]  }
  0xb3   :  { %1228 = vmatprep.subr.bf16.mxu1 %v1855_v26  ;;  %v1939_v26 = vld [vmem:[#allocation10 + $0x1c4] ss:$16 sps:$4 sm:$0xff]  }
  0xf0   :  { %v129_v52 = vpop.permute.xlu0 %128 }
  0xf1   :  { %vm130_vm0 = vcmp.eq.s32.totalorder %v125_v50, %v129_v52  ;;  %vm131_vm1 = vcmp.eq.s32.totalorder %v126_v51, %v129_v52  ;;  %v1882_v50 = vld [vmem:[#allocation10 + $0x8c] ss:$16 sps:$4 sm:$0xff]   ;;  %v1877_v51 = vld [vmem:[#allocation10 + $0x80] ss:$16 sps:$4 sm:$0xff]   ;;  %v1880_v52 = vld [vmem:[#allocation10 + $0x88] ss:$16 sps:$4 sm:$0xff]  }
  0xf2   :  { %vm1555_vm2 = vmpackc.low %vm130_vm0, %vm130_vm0 }
  0xf3   :  { %vm1553_vm3 = vmpackc.low %vm131_vm1, %vm131_vm1 }
  0xf4   :  { %1554 = vmatprep.mubr.msk.bf16.mxu0 %vm1553_vm3, %v2216_v55 }
  0xf5   :  { %1556 = vmatmul.mubr.msk.bf16.vlgmr.msra.gmra.mrb[0].mxu0 %vm1555_vm2, %v2216_v55  ;;  %v1883_v55 = vld [vmem:[#allocation10 + $0xa0] ss:$16 sps:$4 sm:$0xff]  }
  0xf6   :  { %762 = vmatpush1.bf16.msra.mxu0 %v1759_v53  ;;  %793 = vmatprep.mubr.bf16.mxu0 %v313_v25  ;;  %v1885_v53 = vld [vmem:[#allocation10 + $0xa4] ss:$16 sps:$4 sm:$0xff]   ;;  %v1934_v25 = vld [vmem:[#allocation10 + $0x1a8] ss:$16 sps:$4 sm:$0xff]  }
  0xf7   :  { %763 = vmatprep.subr.bf16.mxu0 %v1767_v54  ;;  %v1888_v54 = vld [vmem:[#allocation10 + $0xac] ss:$16 sps:$4 sm:$0xff]  }
  0xfa   :  { %764 = vmatpush1.bf16.msra.mxu0 %v1765_v56  ;;  %v1886_v56 = vld [vmem:[#allocation10 + $0xa8] ss:$16 sps:$4 sm:$0xff]  }
  0xfb   :  { %765 = vmatprep.subr.bf16.mxu0 %v1773_v57  ;;  %v1891_v57 = vld [vmem:[#allocation10 + $0xc4] ss:$16 sps:$4 sm:$0xff]  }
  0xfe   :  { %766 = vmatpush1.bf16.msra.mxu0 %v1771_v58  ;;  %v1894_v58 = vld [vmem:[#allocation10 + $0xcc] ss:$16 sps:$4 sm:$0xff]  }
  0xff   :  { %767 = vmatprep.subr.bf16.mxu0 %v1779_v59  ;;  %v1889_v59 = vld [vmem:[#allocation10 + $0xc0] ss:$16 sps:$4 sm:$0xff]  }
 0x102   :  { %768 = vmatpush1.bf16.msra.mxu0 %v1777_v60  ;;  %v1892_v60 = vld [vmem:[#allocation10 + $0xc8] ss:$16 sps:$4 sm:$0xff]  }
 0x103   :  { %769 = vmatprep.subr.bf16.mxu0 %v1785_v61  ;;  %v1897_v61 = vld [vmem:[#allocation10 + $0xe4] ss:$16 sps:$4 sm:$0xff]  }
 0x106   :  { %770 = vmatpush1.bf16.msra.mxu0 %v1783_v62  ;;  %v1900_v62 = vld [vmem:[#allocation10 + $0xec] ss:$16 sps:$4 sm:$0xff]  }
 0x107   :  { %771 = vmatprep.subr.bf16.mxu0 %v1791_v63  ;;  %v1895_v63 = vld [vmem:[#allocation10 + $0xe0] ss:$16 sps:$4 sm:$0xff]  }
 0x10a   :  { %772 = vmatpush1.bf16.msra.mxu0 %v1789_v1  ;;  %v1898_v1 = vld [vmem:[#allocation10 + $0xe8] ss:$16 sps:$4 sm:$0xff]  }
 0x10b   :  { %773 = vmatprep.subr.bf16.mxu0 %v1797_v2  ;;  %v1903_v2 = vld [vmem:[#allocation10 + $0x104] ss:$16 sps:$4 sm:$0xff]  }
 0x10e   :  { %774 = vmatpush1.bf16.msra.mxu0 %v1795_v3  ;;  %v1906_v3 = vld [vmem:[#allocation10 + $0x10c] ss:$16 sps:$4 sm:$0xff]  }
 0x10f   :  { %775 = vmatprep.subr.bf16.mxu0 %v1803_v4  ;;  %v1901_v4 = vld [vmem:[#allocation10 + $0x100] ss:$16 sps:$4 sm:$0xff]  }
 0x112   :  { %776 = vmatpush1.bf16.msra.mxu0 %v1801_v5  ;;  %v1904_v5 = vld [vmem:[#allocation10 + $0x108] ss:$16 sps:$4 sm:$0xff]  }
 0x113   :  { %777 = vmatprep.subr.bf16.mxu0 %v1809_v6  ;;  %v1909_v6 = vld [vmem:[#allocation10 + $0x124] ss:$16 sps:$4 sm:$0xff]  }
 0x116   :  { %778 = vmatpush1.bf16.msra.mxu0 %v1807_v7  ;;  %v1912_v7 = vld [vmem:[#allocation10 + $0x12c] ss:$16 sps:$4 sm:$0xff]  }
 0x117   :  { %779 = vmatprep.subr.bf16.mxu0 %v1815_v8  ;;  %v1907_v8 = vld [vmem:[#allocation10 + $0x120] ss:$16 sps:$4 sm:$0xff]  }
 0x11a   :  { %780 = vmatpush1.bf16.msra.mxu0 %v1813_v9  ;;  %v1910_v9 = vld [vmem:[#allocation10 + $0x128] ss:$16 sps:$4 sm:$0xff]  }
 0x11b   :  { %781 = vmatprep.subr.bf16.mxu0 %v1821_v10  ;;  %v1915_v10 = vld [vmem:[#allocation10 + $0x144] ss:$16 sps:$4 sm:$0xff]  }
 0x11e   :  { %782 = vmatpush1.bf16.msra.mxu0 %v1819_v11  ;;  %v1918_v11 = vld [vmem:[#allocation10 + $0x14c] ss:$16 sps:$4 sm:$0xff]  }
 0x11f   :  { %783 = vmatprep.subr.bf16.mxu0 %v1827_v12  ;;  %v1913_v12 = vld [vmem:[#allocation10 + $0x140] ss:$16 sps:$4 sm:$0xff]  }
 0x122   :  { %784 = vmatpush1.bf16.msra.mxu0 %v1825_v13  ;;  %v1916_v13 = vld [vmem:[#allocation10 + $0x148] ss:$16 sps:$4 sm:$0xff]  }
 0x123   :  { %785 = vmatprep.subr.bf16.mxu0 %v1833_v14  ;;  %v1921_v14 = vld [vmem:[#allocation10 + $0x164] ss:$16 sps:$4 sm:$0xff]  }
 0x126   :  { %786 = vmatpush1.bf16.msra.mxu0 %v1831_v15  ;;  %v1924_v15 = vld [vmem:[#allocation10 + $0x16c] ss:$16 sps:$4 sm:$0xff]  }
 0x127   :  { %787 = vmatprep.subr.bf16.mxu0 %v1839_v16  ;;  %v1919_v16 = vld [vmem:[#allocation10 + $0x160] ss:$16 sps:$4 sm:$0xff]  }
 0x12a   :  { %788 = vmatpush1.bf16.msra.mxu0 %v1837_v17  ;;  %v1922_v17 = vld [vmem:[#allocation10 + $0x168] ss:$16 sps:$4 sm:$0xff]  }
 0x12b   :  { %789 = vmatprep.subr.bf16.mxu0 %v1845_v18  ;;  %v1927_v18 = vld [vmem:[#allocation10 + $0x184] ss:$16 sps:$4 sm:$0xff]  }
 0x12e   :  { %790 = vmatpush1.bf16.msra.mxu0 %v1843_v19  ;;  %v1930_v19 = vld [vmem:[#allocation10 + $0x18c] ss:$16 sps:$4 sm:$0xff]  }
 0x12f   :  { %791 = vmatprep.subr.bf16.mxu0 %v1851_v21  ;;  %v1928_v21 = vld [vmem:[#allocation10 + $0x188] ss:$16 sps:$4 sm:$0xff]  }
 0x132   :  { %792 = vmatpush1.bf16.msra.mxu0 %v1849_v22  ;;  %v1933_v22 = vld [vmem:[#allocation10 + $0x1a4] ss:$16 sps:$4 sm:$0xff]  }
 0x133   :  { %1269 = vmatprep.subr.bf16.mxu0 %v1858_v27  ;;  %v1942_v27 = vld [vmem:[#allocation10 + $0x1cc] ss:$16 sps:$4 sm:$0xff]  }
 0x1c8   :  { %v1717_v28 = vpop.f32.mrb[0].mxu0 }
 0x1c9   :  { %v1718_v29 = vpop.f32.mrb[1].mxu0 }
 0x1ca   :  { %v1719_v30 = vadd.f32 %v1718_v29, %v1717_v28  ;;  %v1720_v31 = vpop.f32.mrb[2].mxu0  ;;  %v1937_v28 = vld [vmem:[#allocation10 + $0x1c0] ss:$16 sps:$4 sm:$0xff]   ;;  %v1940_v29 = vld [vmem:[#allocation10 + $0x1c8] ss:$16 sps:$4 sm:$0xff]  }
 0x1cb   :  { %v1721_v32 = vpop.f32.mrb[3].mxu0  ;;  %v1948_v31 = vld [vmem:[#allocation10 + $0x1ec] ss:$16 sps:$4 sm:$0xff]  }
 0x1cc   :  { %v312_v35 = vpack.c.bf16 %v1719_v30, %v1719_v30  ;;  %v1945_v30 = vld [vmem:[#allocation10 + $0x1e4] ss:$16 sps:$4 sm:$0xff]   ;;  %v1943_v32 = vld [vmem:[#allocation10 + $0x1e0] ss:$16 sps:$4 sm:$0xff]  }
 0x1ce   :  { %753 = vmatmul.mubr.bf16.vlgmr.msra.gmra.mrb[0].mxu1 %v312_v35  ;;  %794 = vmatmul.mubr.bf16.vlgmr.msra.gmra.mrb[4].mxu0 %v312_v35 }
 0x1cf   :  { %1229 = vmatpush1.bf16.msra.mxu1 %v1853_v33  ;;  %1270 = vmatpush1.bf16.msra.mxu0 %v1856_v34  ;;  %v1946_v33 = vld [vmem:[#allocation10 + $0x1e8] ss:$16 sps:$4 sm:$0xff]  }
 0x1d0   :  { %1230 = vmatprep.subr.bf16.mxu1 %v1861_v36  ;;  %1271 = vmatprep.subr.bf16.mxu0 %v1864_v37  ;;  %v309_v34 = vld [vmem:[#allocation5 + $0x8] sm:$0xff]  ;;  %v2378_v36 = vshrl.u32 %v124_v49, 7 }
 0x1d1   :  { %v821_v35 = vpack.c.bf16 %v309_v34, %v309_v34 }
 0x1d2   :  { %v2381_v37 = vsub.s32 0, %v2378_v36 }
 0x1d3   :  { %1231 = vmatpush1.bf16.msra.mxu1 %v1859_v38  ;;  %1272 = vmatpush1.bf16.msra.mxu0 %v1862_v39  ;;  %v378_v38 = vld [vmem:[%s2459_s5] sm:$0xf]  ;;  %v2387_v39 = vsub.s32 1, %v2378_v36 }
 0x1d4   :  { %1232 = vmatprep.subr.bf16.mxu1 %v1867_v40  ;;  %1273 = vmatprep.subr.bf16.mxu0 %v1870_v41  ;;  %v383_v40 = vrot.slane %v378_v38, %v2381_v37  ;;  %v390_v41 = vsub.s32 2, %v2378_v36 }
 0x1d5   :  { %1260 = vmatprep.mubr.bf16.mxu1 %v821_v35  ;;  %1301 = vmatprep.mubr.bf16.mxu0 %v821_v35 }
 0x1d7   :  { %1233 = vmatpush1.bf16.msra.mxu1 %v1865_v42  ;;  %1274 = vmatpush1.bf16.msra.mxu0 %v1868_v43  ;;  %v387_v42 = vrot.slane %v378_v38, %v2387_v39 }
 0x1d8   :  { %1234 = vmatprep.subr.bf16.mxu1 %v1873_v44  ;;  %1275 = vmatprep.subr.bf16.mxu0 %v1876_v45  ;;  %v391_v45 = vrot.slane %v378_v38, %v390_v41 }
 0x1db   :  { %1235 = vmatpush1.bf16.msra.mxu1 %v1871_v46  ;;  %1276 = vmatpush1.bf16.msra.mxu0 %v1874_v47  ;;  %v394_v47 = vsub.s32 3, %v2378_v36 }
 0x1dc   :  { %1236 = vmatprep.subr.bf16.mxu1 %v1879_v48  ;;  %1277 = vmatprep.subr.bf16.mxu0 %v1882_v50 }
 0x1df   :  { %1237 = vmatpush1.bf16.msra.mxu1 %v1877_v51  ;;  %1278 = vmatpush1.bf16.msra.mxu0 %v1880_v52 }
 0x1e0   :  { %1238 = vmatprep.subr.bf16.mxu1 %v1885_v53  ;;  %1279 = vmatprep.subr.bf16.mxu0 %v1888_v54 }
 0x1e3   :  { %1239 = vmatpush1.bf16.msra.mxu1 %v1883_v55  ;;  %1280 = vmatpush1.bf16.msra.mxu0 %v1886_v56 }
 0x1e4   :  { %1240 = vmatprep.subr.bf16.mxu1 %v1891_v57  ;;  %1281 = vmatprep.subr.bf16.mxu0 %v1894_v58  ;;  %v395_v58 = vrot.slane %v378_v38, %v394_v47 }
 0x1e7   :  { %1241 = vmatpush1.bf16.msra.mxu1 %v1889_v59  ;;  %1282 = vmatpush1.bf16.msra.mxu0 %v1892_v60 }
 0x1e8   :  { %1242 = vmatprep.subr.bf16.mxu1 %v1897_v61  ;;  %1283 = vmatprep.subr.bf16.mxu0 %v1900_v62 }
 0x1eb   :  { %1243 = vmatpush1.bf16.msra.mxu1 %v1895_v63  ;;  %1284 = vmatpush1.bf16.msra.mxu0 %v1898_v1 }
 0x1ec   :  { %1244 = vmatprep.subr.bf16.mxu1 %v1903_v2  ;;  %1285 = vmatprep.subr.bf16.mxu0 %v1906_v3  ;;  %v307_v3 = vld [vmem:[#allocation7] sm:$0xff] }
 0x1ef   :  { %1245 = vmatpush1.bf16.msra.mxu1 %v1901_v4  ;;  %1286 = vmatpush1.bf16.msra.mxu0 %v1904_v5 }
 0x1f0   :  { %1246 = vmatprep.subr.bf16.mxu1 %v1909_v6  ;;  %1287 = vmatprep.subr.bf16.mxu0 %v1912_v7 }
 0x1f3   :  { %1247 = vmatpush1.bf16.msra.mxu1 %v1907_v8  ;;  %1288 = vmatpush1.bf16.msra.mxu0 %v1910_v9 }
 0x1f4   :  { %1248 = vmatprep.subr.bf16.mxu1 %v1915_v10  ;;  %1289 = vmatprep.subr.bf16.mxu0 %v1918_v11 }
 0x1f7   :  { %1249 = vmatpush1.bf16.msra.mxu1 %v1913_v12  ;;  %1290 = vmatpush1.bf16.msra.mxu0 %v1916_v13 }
 0x1f8   :  { %1250 = vmatprep.subr.bf16.mxu1 %v1921_v14  ;;  %1291 = vmatprep.subr.bf16.mxu0 %v1924_v15  ;;  %v1951_v15 = vld [vmem:[#allocation11 + $0x4] ss:$8 sps:$4 sm:$0xff]  }
 0x1fb   :  { %1251 = vmatpush1.bf16.msra.mxu1 %v1919_v16  ;;  %1292 = vmatpush1.bf16.msra.mxu0 %v1922_v17  ;;  %v1949_v16 = vld [vmem:[#allocation11] ss:$8 sps:$4 sm:$0xff]   ;;  %v1954_v17 = vld [vmem:[#allocation11 + $0x14] ss:$8 sps:$4 sm:$0xff]  }
 0x1fc   :  { %1252 = vmatprep.subr.bf16.mxu1 %v1927_v18  ;;  %1293 = vmatprep.subr.bf16.mxu0 %v1930_v19  ;;  %v1952_v18 = vld [vmem:[#allocation11 + $0x10] ss:$8 sps:$4 sm:$0xff]   ;;  %v1957_v19 = vld [vmem:[#allocation11 + $0x24] ss:$8 sps:$4 sm:$0xff]  }
 0x1ff   :  { %1253 = vmatpush1.bf16.msra.mxu1 %v1925_v20  ;;  %1294 = vmatpush1.bf16.msra.mxu0 %v1928_v21  ;;  %v1955_v20 = vld [vmem:[#allocation11 + $0x20] ss:$8 sps:$4 sm:$0xff]   ;;  %v1960_v21 = vld [vmem:[#allocation11 + $0x34] ss:$8 sps:$4 sm:$0xff]  }
 0x200   :  { %1254 = vmatprep.subr.bf16.mxu1 %v1933_v22  ;;  %1295 = vmatprep.subr.bf16.mxu0 %v1936_v23  ;;  %v1958_v22 = vld [vmem:[#allocation11 + $0x30] ss:$8 sps:$4 sm:$0xff]   ;;  %v1963_v23 = vld [vmem:[#allocation11 + $0x44] ss:$8 sps:$4 sm:$0xff]  }
 0x203   :  { %1255 = vmatpush1.bf16.msra.mxu1 %v1931_v24  ;;  %1296 = vmatpush1.bf16.msra.mxu0 %v1934_v25  ;;  %v1961_v24 = vld [vmem:[#allocation11 + $0x40] ss:$8 sps:$4 sm:$0xff]   ;;  %v1964_v25 = vld [vmem:[#allocation11 + $0x50] ss:$8 sps:$4 sm:$0xff]  }
 0x204   :  { %1256 = vmatprep.subr.bf16.mxu1 %v1939_v26  ;;  %1297 = vmatprep.subr.bf16.mxu0 %v1942_v27  ;;  %v1969_v26 = vld [vmem:[#allocation11 + $0x64] ss:$8 sps:$4 sm:$0xff]   ;;  %v1967_v27 = vld [vmem:[#allocation11 + $0x60] ss:$8 sps:$4 sm:$0xff]  }
 0x207   :  { %1257 = vmatpush1.bf16.msra.mxu1 %v1937_v28  ;;  %1298 = vmatpush1.bf16.msra.mxu0 %v1940_v29  ;;  %v1972_v28 = vld [vmem:[#allocation11 + $0x74] ss:$8 sps:$4 sm:$0xff]   ;;  %v1970_v29 = vld [vmem:[#allocation11 + $0x70] ss:$8 sps:$4 sm:$0xff]  }
 0x208   :  { %1258 = vmatprep.subr.bf16.mxu1 %v1945_v30  ;;  %1299 = vmatprep.subr.bf16.mxu0 %v1948_v31  ;;  %v886_v30 = vld [vmem:[%s2461_s7] sm:$0xf]  ;;  %s2217_s7 = smov [#allocation14]  }
 0x209   :  { %v891_v31 = vrot.slane %v886_v30, %v2381_v37  ;;  %v899_v38 = vrot.slane %v886_v30, %v390_v41  ;;  %s1501_s30 = sshll.u32 %s2217_s7, 4  ;;  %s1502_s30 = int_to_ptr.vmem [resolvable:$true] %s1501_s30 }
 0x20a   :  { %s2125_s17 = scalar_lea.vmem %s1502_s30, 256  ;;  %p2130_p7 = scmp.lt.s32.totalorder %s1502_s30, %s1502_s30 }
 0x20b   :  { %1259 = vmatpush1.bf16.msra.mxu1 %v1943_v32  ;;  %1300 = vmatpush1.bf16.msra.mxu0 %v1946_v33  ;;  %v895_v32 = vrot.slane %v886_v30, %v2387_v39  ;;  %p2126_p6 = scmp.ne.s32.totalorder %s1502_s30, %s2125_s17  ;;  %p2131_p8 = scmp.lt.s32.totalorder %s2125_s17, %s2125_s17 }
 0x20c   :  { %1437 = vmatprep.subr.bf16.mxu1 %v1951_v15 }
 0x20d   :  { %p2132_p9 = por %p2131_p8, %p2130_p7 }
 0x20f   :  { %p2133_p10 = pnand %p2132_p9, %p2126_p6 }
 0x2a1   :  { %v754_v43 = vpop.f32.mrb[0].mxu1  ;;  %v795_v44 = vpop.f32.mrb[4].mxu0 }
 0x2a2   :  { %v755_v49 = vadd.f32 %v754_v43, %v383_v40  ;;  %v756_v46 = vpop.f32.mrb[1].mxu1  ;;  %v797_v48 = vpop.f32.mrb[5].mxu0  ;;  %v796_v57 = vadd.f32 %v795_v44, %v391_v45 }
 0x2a3   :  { %v757_v50 = vadd.f32 %v756_v46, %v387_v42  ;;  %v758_v51 = vpop.f32.mrb[2].mxu1  ;;  %v799_v52 = vpop.f32.mrb[6].mxu0  ;;  %v798_v59 = vadd.f32 %v797_v48, %v395_v58 }
 0x2a4   :  { %v802_v53 = vmul.f32 0.5, %v755_v49  ;;  %v759_v54 = vpop.f32.mrb[3].mxu1  ;;  %v800_v55 = vpop.f32.mrb[7].mxu0  ;;  %v903_v52 = vrot.slane %v886_v30, %v394_v47 }
 0x2a5   :  { %v806_v56 = vmul.f32 0.5, %v757_v50  ;;  %v811_v60 = vmul.f32 0.5, %v798_v59  ;;  %v311_v59 = vld [vmem:[#allocation7 + $0x8] sm:$0xff] }
 0x2a6   :  { %1973 = vtanh.f32 %v802_v53 }
 0x2a7   :  { %1975 = vtanh.f32 %v806_v56 }
 0x2a8   :  { %1977 = vtanh.f32 %v796_v57 }
 0x2a9   :  { %1979 = vtanh.f32 %v811_v60 }
 0x2b0   :  { %v1974_v61 = vpop.eup %1973 }
 0x2b1   :  { %v1976_v62 = vpop.eup %1975  ;;  %v804_v63 = vmul.f32 0.5, %v1974_v61 }
 0x2b2   :  { %v808_v1 = vmul.f32 0.5, %v1976_v62  ;;  %v1978_v4 = vpop.eup %1977 }
 0x2b3   :  { %v805_v2 = vadd.f32 0.5, %v804_v63  ;;  %v1980_v9 = vpop.eup %1979 }
 0x2b4   :  { %v809_v5 = vadd.f32 0.5, %v808_v1  ;;  %v813_v10 = vmul.f32 0.5, %v1980_v9 }
 0x2b5   :  { %v816_v6 = vmul.f32 %v1978_v4, %v805_v2 }
 0x2b6   :  { %v815_v7 = vmul.f32 %v809_v5, %v307_v3  ;;  %v814_v11 = vadd.f32 0.5, %v813_v10 }
 0x2b8   :  { %v817_v8 = vadd.f32 %v816_v6, %v815_v7 }
 0x2ba   :  { %1981 = vtanh.f32 %v817_v8  ;;  %1483 = vst [vmem:[#allocation16] sm:$0xff] %v817_v8 }
 0x2c4   :  { %v1982_v12 = vpop.eup %1981 }
 0x2c5   :  { %v819_v13 = vmul.f32 %v1982_v12, %v814_v11 }
 0x2c7   :  { %1480 = vst [vmem:[#allocation14] sm:$0xff] %v819_v13  ;;  %v820_v14 = vpack.c.bf16 %v819_v13, %v819_v13 }
 0x2c9   :  { %1261 = vmatmul.mubr.bf16.vlgmr.msra.gmra.mrb[4].mxu1 %v820_v14  ;;  %1302 = vmatmul.mubr.bf16.vlgmr.msra.gmra.mrb[8].mxu0 %v820_v14 }
 0x2ca   :  { %1469 = vmatprep.mubr.bf16.mxu1 %v2215_v0  ;;  %1438 = vmatpush1.bf16.msra.mxu1 %v1949_v16  ;;  %v1966_v0 = vld [vmem:[#allocation11 + $0x54] ss:$8 sps:$4 sm:$0xff]  }
 0x2cb   :  { %1439 = vmatprep.subr.bf16.mxu1 %v1954_v17 }
 0x2ce   :  { %1440 = vmatpush1.bf16.msra.mxu1 %v1952_v18 }
 0x2cf   :  { %1441 = vmatprep.subr.bf16.mxu1 %v1957_v19 }
 0x2d2   :  { %1442 = vmatpush1.bf16.msra.mxu1 %v1955_v20 }
 0x2d3   :  { %1443 = vmatprep.subr.bf16.mxu1 %v1960_v21 }
 0x2d6   :  { %1444 = vmatpush1.bf16.msra.mxu1 %v1958_v22 }
 0x2d7   :  { %1445 = vmatprep.subr.bf16.mxu1 %v1963_v23 }
 0x2da   :  { %1446 = vmatpush1.bf16.msra.mxu1 %v1961_v24 }
 0x2db   :  { %1447 = vmatprep.subr.bf16.mxu1 %v1966_v0 }
 0x2de   :  { %1448 = vmatpush1.bf16.msra.mxu1 %v1964_v25 }
 0x2df   :  { %1449 = vmatprep.subr.bf16.mxu1 %v1969_v26 }
 0x2e2   :  { %1450 = vmatpush1.bf16.msra.mxu1 %v1967_v27 }
 0x2e3   :  { %1451 = vmatprep.subr.bf16.mxu1 %v1972_v28 }
 0x2e6   :  { %1452 = vmatpush1.bf16.msra.mxu1 %v1970_v29 }
 0x39c   :  { %v1262_v33 = vpop.f32.mrb[4].mxu1  ;;  %v1303_v34 = vpop.f32.mrb[8].mxu0 }
 0x39d   :  { %v1263_v35 = vadd.f32 %v1262_v33, %v891_v31  ;;  %v1264_v40 = vpop.f32.mrb[5].mxu1  ;;  %v1305_v42 = vpop.f32.mrb[9].mxu0  ;;  %v1304_v51 = vadd.f32 %v1303_v34, %v899_v38 }
 0x39e   :  { %v1265_v43 = vadd.f32 %v1264_v40, %v895_v32  ;;  %v1266_v44 = vpop.f32.mrb[6].mxu1  ;;  %v1307_v49 = vpop.f32.mrb[10].mxu0  ;;  %v1306_v53 = vadd.f32 %v1305_v42, %v903_v52 }
 0x39f   :  { %v1310_v45 = vmul.f32 0.5, %v1263_v35  ;;  %v1267_v46 = vpop.f32.mrb[7].mxu1  ;;  %v1308_v48 = vpop.f32.mrb[11].mxu0 }
 0x3a0   :  { %v1314_v50 = vmul.f32 0.5, %v1265_v43  ;;  %v1319_v54 = vmul.f32 0.5, %v1306_v53 }
 0x3a1   :  { %1983 = vtanh.f32 %v1310_v45 }
 0x3a2   :  { %1985 = vtanh.f32 %v1314_v50 }
 0x3a3   :  { %1987 = vtanh.f32 %v1304_v51 }
 0x3a4   :  { %1989 = vtanh.f32 %v1319_v54 }
 0x3ab   :  { %v1984_v55 = vpop.eup %1983 }
 0x3ac   :  { %v1986_v41 = vpop.eup %1985  ;;  %v1312_v56 = vmul.f32 0.5, %v1984_v55 }
 0x3ad   :  { %v1316_v57 = vmul.f32 0.5, %v1986_v41  ;;  %v1988_v60 = vpop.eup %1987 }
 0x3ae   :  { %v1313_v58 = vadd.f32 0.5, %v1312_v56  ;;  %v1990_v36 = vpop.eup %1989 }
 0x3af   :  { %v1317_v61 = vadd.f32 0.5, %v1316_v57  ;;  %v1321_v47 = vmul.f32 0.5, %v1990_v36 }
 0x3b0   :  { %v1324_v62 = vmul.f32 %v1988_v60, %v1313_v58 }
 0x3b1   :  { %v1323_v63 = vmul.f32 %v1317_v61, %v311_v59  ;;  %v1322_v2 = vadd.f32 0.5, %v1321_v47 }
 0x3b3   :  { %v1325_v1 = vadd.f32 %v1324_v62, %v1323_v63 }
 0x3b5   :  { %1991 = vtanh.f32 %v1325_v1  ;;  %1485 = vst [vmem:[#allocation16 + $0x8] sm:$0xff] %v1325_v1 }
 0x3bf   :  { %v1992_v3 = vpop.eup %1991 }
 0x3c0   :  { %v1327_v4 = vmul.f32 %v1992_v3, %v1322_v2 }
 0x3c2   :  { %1482 = vst [vmem:[#allocation14 + $0x8] sm:$0xff] %v1327_v4  ;;  %v1328_v5 = vpack.c.bf16 %v1327_v4, %v1327_v4 }
 0x3c4   :  { %1470 = vmatmul.mubr.bf16.vlgmr.msra.gmra.mrb[8].mxu1 %v1328_v5 }
 0x3c5   :  { %2136 = shalt.err (!%p2133_p10)
}
 0x3c6   :  { %s2137_s3 = scalar_lea.hbm %s2465_s11, 256 }
 0x3c7   :  { %p2138_p11 = scmp.ne.s32.totalorder %s2465_s11, %s2137_s3  ;;  %p2141_p12 = scmp.lt.u32.totalorder %s2137_s3, %s2465_s11 }
 0x3c9   :  { %p2143_p13 = pnand %p2141_p12, %p2138_p11 }
 0x3cb   :  { %2146 = shalt.err (!%p2143_p13)
}
 0x3cc   :  { %1507 = dma.vmem_to_hbm [thread:$0]  %s1502_s30, 256, %s2465_s11, [#allocation15], %s2204_s13, %s2204_s13, %s2205_s14  }
 0x3cd   :  { %s2218_s15 = smov [#allocation16]  }
 0x3ce   :  { %s1513_s4 = sshll.u32 %s2218_s15, 4  ;;  %s1514_s4 = int_to_ptr.vmem [resolvable:$true] %s1513_s4 }
 0x3cf   :  { %s2147_s18 = scalar_lea.vmem %s1514_s4, 256  ;;  %p2152_p1 = scmp.lt.s32.totalorder %s1514_s4, %s1514_s4 }
 0x3d0   :  { %p2148_p0 = scmp.ne.s32.totalorder %s1514_s4, %s2147_s18  ;;  %p2153_p2 = scmp.lt.s32.totalorder %s2147_s18, %s2147_s18 }
 0x3d2   :  { %p2154_p3 = por %p2153_p2, %p2152_p1 }
 0x3d4   :  { %p2155_p4 = pnand %p2154_p3, %p2148_p0 }
 0x3d6   :  { %2158 = shalt.err (!%p2155_p4)
}
 0x3d7   :  { %s2159_s6 = scalar_lea.hbm %s2466_s12, 256 }
 0x3d8   :  { %p2160_p5 = scmp.ne.s32.totalorder %s2466_s12, %s2159_s6  ;;  %p2163_p6 = scmp.lt.u32.totalorder %s2159_s6, %s2466_s12 }
 0x3da   :  { %p2165_p7 = pnand %p2163_p6, %p2160_p5 }
 0x3dc   :  { %2168 = shalt.err (!%p2165_p7)
}
 0x3dd   :  { %1519 = dma.vmem_to_hbm [thread:$0]  %s1514_s4, 256, %s2466_s12, [#allocation15], %s2204_s13, %s2204_s13, %s2205_s14  }
 0x3de   :  { %v1345_v6 = vld [vmem:[%s2463_s9] sm:$0x3]  ;;  %s2219_s7 = smov [#allocation13]  }
 0x3df   :  { %v1350_v7 = vrot.slane %v1345_v6, %v2381_v37  ;;  %v1354_v8 = vrot.slane %v1345_v6, %v2387_v39  ;;  %s1492_s30 = sshll.u32 %s2219_s7, 4  ;;  %s1493_s30 = int_to_ptr.vmem [resolvable:$true] %s1492_s30 }
 0x3e0   :  { %s2169_s12 = scalar_lea.vmem %s1493_s30, 256  ;;  %p2174_p9 = scmp.lt.s32.totalorder %s1493_s30, %s1493_s30 }
 0x3e1   :  { %p2170_p8 = scmp.ne.s32.totalorder %s1493_s30, %s2169_s12  ;;  %p2175_p10 = scmp.lt.s32.totalorder %s2169_s12, %s2169_s12 }
 0x3e3   :  { %p2176_p11 = por %p2175_p10, %p2174_p9 }
 0x3e5   :  { %p2177_p12 = pnand %p2176_p11, %p2170_p8 }
 0x497   :  { %v1471_v9 = vpop.f32.mrb[8].mxu1 }
 0x498   :  { %v1472_v10 = vadd.f32 %v1471_v9, %v1350_v7  ;;  %v1473_v11 = vpop.f32.mrb[9].mxu1 }
 0x499   :  { %v1474_v12 = vadd.f32 %v1473_v11, %v1354_v8  ;;  %v1475_v13 = vpop.f32.mrb[10].mxu1 }
 0x49a   :  { %1478 = vst [vmem:[#allocation13] sm:$0xff] %v1472_v10  ;;  %v1476_v14 = vpop.f32.mrb[11].mxu1 }
 0x49b   :  { %1479 = vst [vmem:[#allocation13 + $0x8] sm:$0xff] %v1474_v12 }
 0x49c   :  { %2180 = shalt.err (!%p2177_p12)
}
 0x49d   :  { %s2181_s14 = scalar_lea.hbm %s2464_s10, 256 }
 0x49e   :  { %p2182_p13 = scmp.ne.s32.totalorder %s2464_s10, %s2181_s14  ;;  %p2185_p0 = scmp.lt.u32.totalorder %s2181_s14, %s2464_s10 }
 0x4a0   :  { %p2187_p1 = pnand %p2185_p0, %p2182_p13 }
 0x4a2   :  { %2190 = shalt.err (!%p2187_p1)
}
 0x4a3   :  { %1495 = dma.vmem_to_hbm [thread:$0]  %s1493_s30, 256, %s2464_s10, [#allocation4]  }
 0x4a4   :  { %2199 = dma.done.wait [#allocation4], 256  }
 0x4a5   :  { %2200 = vsyncadd [#allocation4], 4294967040 }
 0x4a6   :  { %2201 = dma.done.wait [#allocation15], 512  }
 0x4a7   :  { %2202 = vsyncadd [#allocation15], 4294966784 }
 0x4a8   :  { %1529 = vsyncpa [#allocation3], 1 }
 0x4a9   :  { %1530 = vsyncpa [#allocation6], 1 }
 0x4aa   :  { %1531 = vsyncpa [#allocation9], 1 }
 0x4ab   :  { %1532 = vsyncpa [#allocation12], 1 }
 0x4ac   :  { %1533 = vsyncpa [#allocation4], 1 }
 0x4ad   :  { %1534 = vsyncpa [#allocation15], 1 }

</bundles_post_ra>
